<compile_context>
chip_gen: v5e
topology: v5e:2x2
jax: 0.10.0
libtpu: 0.0.40
codegen_flags: <defaults>
</compile_context>

<pallas_src>
import functools

import jax
import jax.numpy as jnp
from jax import lax
from jax.experimental import pallas as pl
from jax.experimental.pallas import tpu as pltpu

LANES = 128
SUBLANES = 8
NUM_SHARDS = 2          # leading "parallel" grid axis -> 2 TensorCores on v7x
MAX_BLOCK_ROWS = 8192   # 8192 x 128 x 4B = 4 MiB per f32 input block
ROWS_PER_CHUNK = 128    # 16 f32 vregs per operand chunk: stays in registers


def _round_up(x, m):
    return ((x + m - 1) // m) * m


def _dice_partial_kernel(p_ref, t_ref, inter_ref, denom_ref, *,
                         blocks_per_shard, num_valid_blocks, block_rows,
                         total_rows):
    s = pl.program_id(0)          # shard (parallel)
    i = pl.program_id(1)          # row-block within shard (arbitrary)
    b = s * blocks_per_shard + i  # global row-block index

    # Output tiles are resident across the inner axis: init once per shard.
    @pl.when(i == 0)
    def _init():
        inter_ref[...] = jnp.zeros_like(inter_ref)
        denom_ref[...] = jnp.zeros_like(denom_ref)

    def accumulate(valid_rows):
        # `valid_rows` is a static Python int: number of in-bounds rows of
        # this block.  Chunked so per-chunk intermediates fit in vregs.
        for c0 in range(0, block_rows, ROWS_PER_CHUNK):
            if c0 >= valid_rows:
                break  # rest of the block is out of bounds (static skip)
            nrows = min(ROWS_PER_CHUNK, block_rows - c0)
            p = p_ref[c0:c0 + nrows, :].astype(jnp.float32)
            t = t_ref[c0:c0 + nrows, :].astype(jnp.float32)
            if c0 + nrows > valid_rows:
                # Partially valid chunk: static mask (only the final ragged
                # block ever reaches this path).
                row = c0 + lax.broadcasted_iota(jnp.int32, p.shape, 0)
                keep = row < valid_rows
                p = jnp.where(keep, p, 0.0)
                t = jnp.where(keep, t, 0.0)
            # Layout-free sublane-group split + VALU tree-add into a single
            # vreg-sized accumulator tile.
            pr = p.reshape(-1, SUBLANES, LANES)
            tr = t.reshape(-1, SUBLANES, LANES)
            inter_ref[...] += jnp.sum(pr * tr, axis=0)   # -> sum(p*t)
            denom_ref[...] += jnp.sum(pr + tr, axis=0)   # -> sum(p)+sum(t)

    ragged = (total_rows % block_rows) != 0
    padded_grid = (NUM_SHARDS * blocks_per_shard) != num_valid_blocks

    if not ragged and not padded_grid:
        # Every grid step is a full, valid block: single unmasked fast path.
        accumulate(block_rows)
    else:
        last = num_valid_blocks - 1
        last_rows = total_rows - last * block_rows  # rows in the final block

        @pl.when(b < last)
        def _full_blocks():
            accumulate(block_rows)

        @pl.when(b == last)
        def _last_block():
            accumulate(last_rows)
        # b > last (duplicated, clamped blocks of a padded grid): skipped.


def dice_loss(predictions, targets, smooth=1e-6):
    """Pallas implementation of DiceLoss.forward (returns scalar f32)."""
    p = jnp.reshape(predictions, (-1,))
    t = jnp.reshape(targets, (-1,))
    n = p.shape[0]
    smooth = float(smooth)  # python float -> literal in the traced math

    rows = n // LANES          # full 128-wide rows handled by the kernel
    n_main = rows * LANES

    if rows < SUBLANES:
        # Tiny input: a kernel launch isn't worth it.
        pf = p.astype(jnp.float32)
        tf = t.astype(jnp.float32)
        inter = jnp.sum(pf * tf)
        denom = jnp.sum(pf) + jnp.sum(tf)
        return 1.0 - (2.0 * inter + smooth) / (denom + smooth)

    # No padding of the full arrays: the <128-element tail is summed in the
    # wrapper below.  (For n % 128 == 0 this slice+reshape is a no-op view.)
    p_main = p[:n_main].reshape(rows, LANES)
    t_main = t[:n_main].reshape(rows, LANES)

    # Block size: as large as possible (HBM-bound), balanced across shards,
    # always a multiple of 8 so the (8,128) rule and the sublane-group
    # reshape hold.
    block_rows = min(MAX_BLOCK_ROWS,
                     _round_up(pl.cdiv(rows, NUM_SHARDS), SUBLANES))
    num_blocks = pl.cdiv(rows, block_rows)
    blocks_per_shard = pl.cdiv(num_blocks, NUM_SHARDS)

    if NUM_SHARDS * blocks_per_shard == num_blocks:
        def in_index(s, i):
            return (s * blocks_per_shard + i, 0)
    else:
        # Padded grid: clamp so duplicated trailing steps never DMA out of
        # bounds (the kernel skips their accumulation).
        def in_index(s, i):
            return (jnp.minimum(s * blocks_per_shard + i, num_blocks - 1), 0)

    kernel = functools.partial(
        _dice_partial_kernel,
        blocks_per_shard=blocks_per_shard,
        num_valid_blocks=num_blocks,
        block_rows=block_rows,
        total_rows=rows,
    )

    out_rows = NUM_SHARDS * SUBLANES
    inter_p, denom_p = pl.pallas_call(
        kernel,
        out_shape=(
            jax.ShapeDtypeStruct((out_rows, LANES), jnp.float32),
            jax.ShapeDtypeStruct((out_rows, LANES), jnp.float32),
        ),
        grid_spec=pltpu.PrefetchScalarGridSpec(
            num_scalar_prefetch=0,
            grid=(NUM_SHARDS, blocks_per_shard),
            in_specs=[
                pl.BlockSpec((block_rows, LANES), in_index),
                pl.BlockSpec((block_rows, LANES), in_index),
            ],
            out_specs=[
                pl.BlockSpec((SUBLANES, LANES), lambda s, i: (s, 0)),
                pl.BlockSpec((SUBLANES, LANES), lambda s, i: (s, 0)),
            ],
        ),
        compiler_params=pltpu.CompilerParams(
            # shard axis parallel (v7x megacore), row-block axis is the
            # reduction with resident output accumulators.
            dimension_semantics=("parallel", "arbitrary"),
            # 8192-row f32 blocks -> ~16 MiB double-buffered working set;
            # raise above v5e's 16 MiB scoped default.
            vmem_limit_bytes=32 * 1024 * 1024,
        ),
    )(p_main, t_main)

    inter = jnp.sum(inter_p)
    denom = jnp.sum(denom_p)

    tail = n - n_main
    if tail:
        p_tail = p[n_main:].astype(jnp.float32)
        t_tail = t[n_main:].astype(jnp.float32)
        inter = inter + jnp.sum(p_tail * t_tail)
        denom = denom + jnp.sum(p_tail) + jnp.sum(t_tail)

    dice = (2.0 * inter + smooth) / (denom + smooth)
    return 1.0 - dice


def dice_loss_ref(predictions, targets, smooth=1e-6):
    p = jnp.reshape(predictions, (-1,)).astype(jnp.float32)
    t = jnp.reshape(targets, (-1,)).astype(jnp.float32)
    inter = jnp.sum(p * t)
    dice = (2.0 * inter + smooth) / (jnp.sum(p) + jnp.sum(t) + smooth)
    return 1.0 - dice


if __name__ == "__main__":
    key = jax.random.PRNGKey(0)
    k1, k2, k3, k4 = jax.random.split(key, 4)

    # predictions ~ sigmoid logits, targets ~ binary mask, NCHW (2, 4, 16, 16)
    preds = jax.nn.sigmoid(jax.random.normal(k1, (2, 4, 16, 16), dtype=jnp.float32))
    targs = (jax.random.uniform(k2, (2, 4, 16, 16)) > 0.5).astype(jnp.float32)

    loss = jax.block_until_ready(dice_loss(preds, targs))
    ref = jax.block_until_ready(dice_loss_ref(preds, targs))
    assert jnp.allclose(loss, ref, atol=1e-5, rtol=1e-5), (loss, ref)

    # Ragged shape: exercises the masked final block and the lane-tail path.
    preds2 = jax.nn.sigmoid(jax.random.normal(k3, (3, 5, 7, 11), dtype=jnp.float32))
    targs2 = (jax.random.uniform(k4, (3, 5, 7, 11)) > 0.5).astype(jnp.float32)

    loss2 = jax.block_until_ready(dice_loss(preds2, targs2))
    ref2 = jax.block_until_ready(dice_loss_ref(preds2, targs2))
    assert jnp.allclose(loss2, ref2, atol=1e-5, rtol=1e-5), (loss2, ref2)

    print("KERNEL_OK")
</pallas_src>

<mosaic_0001>
module attributes {stable_mosaic.version = 11 : i64} {
  func.func @_dice_partial_kernel(%arg0: i32, %arg1: i32, %arg2: memref<8x128xf32, #tpu.memory_space<vmem>>, %arg3: memref<8x128xf32, #tpu.memory_space<vmem>>, %arg4: memref<8x128xf32, #tpu.memory_space<vmem>>, %arg5: memref<8x128xf32, #tpu.memory_space<vmem>>) attributes {dimension_semantics = [#tpu.dimension_semantics<parallel>, #tpu.dimension_semantics<arbitrary>], iteration_bounds = array<i64: 2, 1>, scalar_prefetch = 0 : i64, scratch_operands = 0 : i64, tpu.core_type = #tpu.core_type<tc>, window_params = [{transform_indices = @transform_0, window_bounds = array<i64: 8, 128>}, {transform_indices = @transform_1, window_bounds = array<i64: 8, 128>}, {transform_indices = @transform_2, window_bounds = array<i64: 8, 128>}, {transform_indices = @transform_3, window_bounds = array<i64: 8, 128>}]} {
    %c0_i32 = arith.constant 0 : i32
    %0 = arith.cmpi eq, %arg1, %c0_i32 : i32
    %1 = arith.extui %0 : i1 to i32
    %c0_i32_0 = arith.constant 0 : i32
    %2 = arith.cmpi ne, %1, %c0_i32_0 : i32
    scf.if %2 {
      %cst_13 = arith.constant 0.000000e+00 : f32
      %17 = vector.broadcast %cst_13 : f32 to vector<8x128xf32>
      %c0_14 = arith.constant 0 : index
      %c0_15 = arith.constant 0 : index
      %18 = vector.load %arg4[%c0_14, %c0_15] : memref<8x128xf32, #tpu.memory_space<vmem>>, vector<8x128xf32>
      tpu.vector_store %arg4[%c0_14, %c0_15], %17 {strides = array<i32>} : memref<8x128xf32, #tpu.memory_space<vmem>>, vector<8x128xf32>,
      %cst_16 = arith.constant 0.000000e+00 : f32
      %19 = vector.broadcast %cst_16 : f32 to vector<8x128xf32>
      %c0_17 = arith.constant 0 : index
      %c0_18 = arith.constant 0 : index
      %20 = vector.load %arg5[%c0_17, %c0_18] : memref<8x128xf32, #tpu.memory_space<vmem>>, vector<8x128xf32>
      tpu.vector_store %arg5[%c0_17, %c0_18], %19 {strides = array<i32>} : memref<8x128xf32, #tpu.memory_space<vmem>>, vector<8x128xf32>,
    } else {
    }
    %c0 = arith.constant 0 : index
    %c0_1 = arith.constant 0 : index
    %3 = vector.load %arg2[%c0, %c0_1] : memref<8x128xf32, #tpu.memory_space<vmem>>, vector<8x128xf32>
    %c0_2 = arith.constant 0 : index
    %c0_3 = arith.constant 0 : index
    %4 = vector.load %arg3[%c0_2, %c0_3] : memref<8x128xf32, #tpu.memory_space<vmem>>, vector<8x128xf32>
    %5 = vector.shape_cast %3 : vector<8x128xf32> to vector<1x8x128xf32>
    %6 = vector.shape_cast %4 : vector<8x128xf32> to vector<1x8x128xf32>
    %c0_4 = arith.constant 0 : index
    %c0_5 = arith.constant 0 : index
    %7 = vector.load %arg4[%c0_4, %c0_5] : memref<8x128xf32, #tpu.memory_space<vmem>>, vector<8x128xf32>
    %8 = arith.mulf %5, %6 : vector<1x8x128xf32>
    %cst = arith.constant dense<0.000000e+00> : vector<8x128xf32>
    %9 = vector.multi_reduction <add>, %8, %cst [0] : vector<1x8x128xf32> to vector<8x128xf32>
    %10 = arith.addf %7, %9 : vector<8x128xf32>
    %c0_6 = arith.constant 0 : index
    %c0_7 = arith.constant 0 : index
    %11 = vector.load %arg4[%c0_6, %c0_7] : memref<8x128xf32, #tpu.memory_space<vmem>>, vector<8x128xf32>
    tpu.vector_store %arg4[%c0_6, %c0_7], %10 {strides = array<i32>} : memref<8x128xf32, #tpu.memory_space<vmem>>, vector<8x128xf32>,
    %c0_8 = arith.constant 0 : index
    %c0_9 = arith.constant 0 : index
    %12 = vector.load %arg5[%c0_8, %c0_9] : memref<8x128xf32, #tpu.memory_space<vmem>>, vector<8x128xf32>
    %13 = arith.addf %5, %6 : vector<1x8x128xf32>
    %cst_10 = arith.constant dense<0.000000e+00> : vector<8x128xf32>
    %14 = vector.multi_reduction <add>, %13, %cst_10 [0] : vector<1x8x128xf32> to vector<8x128xf32>
    %15 = arith.addf %12, %14 : vector<8x128xf32>
    %c0_11 = arith.constant 0 : index
    %c0_12 = arith.constant 0 : index
    %16 = vector.load %arg5[%c0_11, %c0_12] : memref<8x128xf32, #tpu.memory_space<vmem>>, vector<8x128xf32>
    tpu.vector_store %arg5[%c0_11, %c0_12], %15 {strides = array<i32>} : memref<8x128xf32, #tpu.memory_space<vmem>>, vector<8x128xf32>,
    return
  }
  func.func @transform_0(%arg0: i32, %arg1: i32) -> (i32, i32) {
    %c1_i32 = arith.constant 1 : i32
    %0 = arith.muli %arg0, %c1_i32 : i32
    %1 = arith.addi %0, %arg1 : i32
    %c0_i32 = arith.constant 0 : i32
    %c0_i32_0 = arith.constant 0 : i32
    return %1, %c0_i32 : i32, i32
  }
  func.func @transform_1(%arg0: i32, %arg1: i32) -> (i32, i32) {
    %c1_i32 = arith.constant 1 : i32
    %0 = arith.muli %arg0, %c1_i32 : i32
    %1 = arith.addi %0, %arg1 : i32
    %c0_i32 = arith.constant 0 : i32
    %c0_i32_0 = arith.constant 0 : i32
    return %1, %c0_i32 : i32, i32
  }
  func.func @transform_2(%arg0: i32, %arg1: i32) -> (i32, i32) {
    %c0_i32 = arith.constant 0 : i32
    %c0_i32_0 = arith.constant 0 : i32
    return %arg0, %c0_i32 : i32, i32
  }
  func.func @transform_3(%arg0: i32, %arg1: i32) -> (i32, i32) {
    %c0_i32 = arith.constant 0 : i32
    %c0_i32_0 = arith.constant 0 : i32
    return %arg0, %c0_i32 : i32, i32
  }
}

</mosaic_0001>

<bundles_post_ra>
// kernel: tpu_custom_call.1
= control target key start
LH: loop header
LB: loop body
LE: loop exit
PB: predicated region body
PF: predicated region fallthrough
CT: control target
= control target key end

     0   :  { %9 = vsyncpa [#allocation3], 0  ;;  %s893_s0 = inlined_call_operand.hbm [shape: f32[16,128], index: 0, kind: input, shape index: {}]   ;;  %s894_s1 = inlined_call_operand.hbm [shape: f32[16,128], index: 1, kind: input, shape index: {}]   ;;  %s895_s2 = inlined_call_operand.hbm [shape: f32[16,128], index: 2, kind: output, shape index: {0}]   ;;  %s896_s3 = inlined_call_operand.hbm [shape: f32[16,128], index: 3, kind: output, shape index: {1}]  }
   0x1   :  { %11 = vsyncpa [#allocation3 + $0x1], 0 }
   0x2   :  { %12 = vsyncpa [#allocation6], 0 }
   0x3   :  { %14 = vsyncpa [#allocation6 + $0x1], 0 }
   0x4   :  { %15 = vsyncpa [#allocation4], 0 }
   0x5   :  { %17 = vsyncpa [#allocation4 + $0x1], 0 }
   0x6   :  { %18 = vsyncpa [#allocation9], 0 }
   0x7   :  { %20 = vsyncpa [#allocation9 + $0x1], 0  ;;  %s739_s12 = smov 0   ;;  %s741_s13 = smov 0  }
   0x8   :  { %s743_s14 = smov 0   ;;  %s745_s15 = smov 0  }
   0x9   :  { %s747_s16 = smov 0   ;;  %s749_s17 = smov 0  }
   0xa LB: > { %s447_s18 = sadd.s32 4294967295, %s717_s17   ;;  %s448_s19 = sadd.s32 4294967294, %s717_s17   ;;  %s717_s17 = sphi %s749_s17, %s26_s17   ;;  %s713_s16 = sphi %s747_s16, %s905_s16   ;;  %s709_s15 = sphi %s745_s15, %s904_s15   ;;  %s705_s14 = sphi %s743_s14, %s903_s14   ;;  %s701_s13 = sphi %s741_s13, %s902_s13   ;;  %s697_s12 = sphi %s739_s12, %s901_s12  }
   0xb   : > { %s38_s20 = sadd.s32 1, %s713_s16  ;;  %s47_s21 = sadd.s32 1, %s705_s14 }
   0xc   : > { %p40_p0 = scmp.ge.s32.totalorder %s38_s20, 2  ;;  %p54_p1 = scmp.ne.s32.totalorder %s705_s14, %s701_s13 }
   0xd   : > { %p55_p2 = scmp.eq.s32.totalorder %s717_s17, 0  ;;  %p60_p3 = scmp.ne.s32.totalorder %s701_s13, %s697_s12 }
   0xe   : > { %s907_s20 = smov (%p40_p0, %s38_s20), 0  ;;  %p61_p5 = scmp.eq.s32.totalorder %s447_s18, 0 }
   0xf   : > { %p780_p4 = por %p55_p2, %p54_p1  ;;  %s44_s23 = ssub.s32 %s713_s16, %s907_s20 }
  0x10   : > { %p112_p6 = scmp.eq.s32.totalorder %s447_s18, 1  ;;  %p45_p7 = scmp.eq.s32.totalorder %s44_s23, 0 }
  0x11   : > { %p786_p8 = por %p61_p5, %p60_p3  ;;  %p118_p10 = scmp.eq.s32.totalorder %s448_s19, 1 }
  0x12   : > { %p790_p9 = por %p112_p6, %p54_p1  ;;  %p450_p12 = scmp.ge.s32.totalorder %s717_s17, 2 }
  0x13   : > { %s795_s26 = scalar_select %p45_p7, %s705_s14, %s47_s21  }
  0x14   : > { %p797_p11 = por %p118_p10, %p60_p3  ;;  %p488_p13 = scmp.lt.s32.totalorder %s717_s17, 2 }
  0x15   : > { %s164_s28 = sand.u32 1, %s705_s14   ;;  %s452_s30 = sshll.u32 %s713_s16, 3 }
  0x16   : > { %s451_s29 = sshll.u32 %s164_s28, 3  ;;  %s173_s6 = scalar_lea.hbm %s893_s0, %s452_s30 }
  0x17   : > { %s168_s7 = scalar_lea.vmem [#allocation2], %s451_s29  ;;  %s175_s9 = sshll.u32 %s173_s6, 4  ;;  %s176_s9 = int_to_ptr.hbm [resolvable:$true] %s175_s9 }
  0x18   : > { %s177_s8 = sshll.u32 %s168_s7, 4  ;;  %p475_p0 = pnand %p488_p13, %p780_p4  ;;  %s178_s8 = int_to_ptr.vmem [resolvable:$true] %s177_s8 }
  0x19   : > { %p455_p1 = scmp.ge.s32.totalorder %s717_s17, 1  ;;  %p202_p2 = scmp.lt.s32.totalorder %s717_s17, 3 }
  0x1a   : > { %s165_s10 = scalar_lea.sflag [#allocation3], %s164_s28  ;;  %s193_s19 = scalar_lea.hbm %s894_s1, %s452_s30 }
  0x1b   : > { %477 = dma.hbm_to_vmem [thread:$0]  (!%p475_p0), %s176_s9, 128, %s178_s8, %s165_s10  }
  0x1c   : > { %p203_p3 = pnand %p455_p1, %p202_p2  ;;  %s188_s21 = scalar_lea.vmem [#allocation5], %s451_s29 }
  0x1d   : > { %s197_s23 = sshll.u32 %s188_s21, 4  ;;  %s195_s4 = sshll.u32 %s193_s19, 4  ;;  %s198_s23 = int_to_ptr.vmem [resolvable:$true] %s197_s23  ;;  %s196_s4 = int_to_ptr.hbm [resolvable:$true] %s195_s4 }
  0x1e   : > { %s185_s5 = scalar_lea.sflag [#allocation6], %s164_s28  ;;  %206 = sbr.rel (%p203_p3) target bundleno = 67 (0x43), region = 28 }
  0x1f   : > { %480 = dma.hbm_to_vmem [thread:$0]  (!%p475_p0), %s196_s4, 128, %s198_s23, %s185_s5  }
  0x20   : > { %s816_s22 = sand.u32 (!%p203_p3), 1, %s701_s13  }
  0x21   : > { %s456_s6 = sshll.u32 (!%p203_p3), %s816_s22, 3  ;;  %s209_s7 = scalar_lea.sflag (!%p203_p3), [#allocation3], %s816_s22 }
  0x22   : > { %s212_s8 = scalar_lea.vmem (!%p203_p3), [#allocation2], %s456_s6 }
  0x23   : > { %680 = dma.done.wait (%p786_p8), %s209_s7, 128  }
  0x24   : > { %682 = vsyncadd (%p786_p8), %s209_s7, 4294967168  ;;  %s219_s29 = scalar_lea.sflag [#allocation6], %s816_s22  ;;  %s222_s28 = scalar_lea.vmem [#allocation5], %s456_s6 }
  0x25   : > { %684 = dma.done.wait (%p786_p8), %s219_s29, 128  }
  0x26   : > { %686 = vsyncadd (%p786_p8), %s219_s29, 4294967168  ;;  %s462_s30 = sshll.u32 %s709_s15, 3  ;;  %s248_s23 = scalar_lea.vmem [#allocation7], %s456_s6  ;;  %v264_v0 = vld [vmem:[%s212_s8] sm:$0xff]  ;;  %v265_v1 = vld [vmem:[%s222_s28] sm:$0xff] }
  0x27   : > { %s292_s11 = scalar_lea.hbm %s895_s2, %s462_s30  ;;  %s306_s21 = scalar_lea.hbm %s896_s3, %s462_s30  ;;  %v267_v2 = vmul.f32 %v265_v1, %v264_v0  ;;  %v272_v3 = vadd.f32 %v265_v1, %v264_v0 }
  0x28   : > { %s836_s4 = sshll.u32 %s248_s23, 4  ;;  %s296_s5 = sshll.u32 %s292_s11, 4  ;;  %s295_s4 = int_to_ptr.vmem [resolvable:$true] %s836_s4  ;;  %s297_s5 = int_to_ptr.hbm [resolvable:$true] %s296_s5 }
  0x29   : > { %s255_s15 = scalar_lea.vmem [#allocation8], %s456_s6  ;;  %s310_s7 = sshll.u32 %s306_s21, 4  ;;  %270 = vst [vmem:[%s248_s23] sm:$0xff] %v267_v2  ;;  %s842_s7 = int_to_ptr.hbm [resolvable:$true] %s310_s7 }
  0x2a   : > { %s838_s24 = sshll.u32 %s255_s15, 4  ;;  %275 = vst [vmem:[%s255_s15] sm:$0xff] %v272_v3  ;;  %s277_s29 = scalar_lea.sflag [#allocation4], %s816_s22  ;;  %s309_s24 = int_to_ptr.vmem [resolvable:$true] %s838_s24 }
  0x2b   : > { %s613_s30 = sshra.s32 %s297_s5, 4  ;;  %s619_s9 = scalar_lea.hbm %s895_s2, 16  ;;  %s614_s30 = int_to_ptr.hbm [resolvable:$true] %s613_s30 }
  0x2c   : > { %s615_s8 = scalar_lea.hbm %s614_s30, 8  ;;  %p620_p7 = scmp.lt.s32.totalorder %s614_s30, %s895_s2 }
  0x2d   : > { %p616_p4 = scmp.ne.s32.totalorder %s614_s30, %s615_s8  ;;  %p621_p8 = scmp.lt.s32.totalorder %s619_s9, %s615_s8 }
  0x2f   : > { %p617_p5 = pnand %p616_p4, %p790_p9  ;;  %p622_p10 = por %p621_p8, %p620_p7 }
  0x31   : > { %p618_p6 = pneg %p617_p5 }
  0x33   : > { %p623_p13 = pnand %p622_p10, %p618_p6 }
  0x35   : > { %626 = shalt.err (!%p623_p13)
}
  0x36   : > { %470 = dma.vmem_to_hbm [thread:$0]  (%p790_p9), %s295_s4, 128, %s297_s5, %s277_s29  }
  0x37   : > { %s282_s18 = scalar_lea.sflag [#allocation9], %s816_s22  ;;  %s641_s19 = sshra.s32 %s842_s7, 4  ;;  %s642_s19 = int_to_ptr.hbm [resolvable:$true] %s641_s19 }
  0x38   : > { %s643_s21 = scalar_lea.hbm %s642_s19, 8  ;;  %s647_s30 = scalar_lea.hbm %s896_s3, 16 }
  0x39   : > { %p644_p0 = scmp.ne.s32.totalorder %s642_s19, %s643_s21  ;;  %p648_p3 = scmp.lt.s32.totalorder %s642_s19, %s896_s3 }
  0x3a   : > { %p649_p4 = scmp.lt.s32.totalorder %s647_s30, %s643_s21 }
  0x3b   : > { %p645_p1 = pnand %p644_p0, %p790_p9 }
  0x3c   : > { %p650_p5 = por %p649_p4, %p648_p3 }
  0x3d   : > { %p646_p2 = pneg %p645_p1 }
  0x3f   : > { %p651_p6 = pnand %p650_p5, %p646_p2 }
  0x41   : > { %654 = shalt.err (!%p651_p6)
}
  0x42   : > { %471 = dma.vmem_to_hbm [thread:$0]  (%p790_p9), %s309_s24, 128, %s842_s7, %s282_s18  }
  0x43 PF: > { %s322_s22 = sand.u32 1, %s697_s12   ;;  %p482_p7 = pnand %p450_p12, %p797_p11 }
  0x44   : > { %s323_s4 = scalar_lea.sflag [#allocation4], %s322_s22 }
  0x45   : > { %p483_p8 = pneg %p482_p7 }
  0x47   : > { %688 = dma.done.wait (%p483_p8), %s323_s4, 128  }
  0x48   : > { %690 = vsyncadd (%p483_p8), %s323_s4, 4294967168  ;;  %s333_s5 = scalar_lea.sflag [#allocation9], %s322_s22 }
  0x49   : > { %692 = dma.done.wait (%p483_p8), %s333_s5, 128  }
  0x4a   : > { %694 = vsyncadd (%p483_p8), %s333_s5, 4294967168  ;;  %s26_s17 = sadd.s32 1, %s717_s17   ;;  %s901_s12 = smov %s701_s13 }
  0x4b   : > { %p23_p10 = scmp.ge.s32.totalorder %s26_s17, 4   ;;  %s902_s13 = smov %s705_s14 }
  0x4c   : > { %s903_s14 = smov %s795_s26  ;;  %s904_s15 = smov %s713_s16 }
  0x4d   : > { %s905_s16 = smov %s907_s20  ;;  %25 = sbr.rel (!%p23_p10) target bundleno = 10 (0xa), region = 107 }
  0x52   :  { %339 = vsyncpa [#allocation3], 1 }
  0x53   :  { %341 = vsyncpa [#allocation3 + $0x1], 1 }
  0x54   :  { %342 = vsyncpa [#allocation6], 1 }
  0x55   :  { %344 = vsyncpa [#allocation6 + $0x1], 1 }
  0x56   :  { %345 = vsyncpa [#allocation4], 1 }
  0x57   :  { %347 = vsyncpa [#allocation4 + $0x1], 1 }
  0x58   :  { %348 = vsyncpa [#allocation9], 1 }
  0x59   :  { %350 = vsyncpa [#allocation9 + $0x1], 1 }

</bundles_post_ra>
